<compile_context>
chip_gen: v7x
topology: tpu7x:2x2x1
jax: 0.10.0
libtpu: 0.0.40
codegen_flags: <defaults>
</compile_context>

<pallas_src>
import functools

import jax
import jax.numpy as jnp
from jax.experimental import pallas as pl
from jax.experimental.pallas import tpu as pltpu

_LANE = 128
# Per-block byte budget for the image/output tiles.  The kernel is purely
# HBM-bandwidth bound; fat blocks amortize the ~0.35us per-grid-step overhead.
_TARGET_BLOCK_BYTES = 4 << 20
# Cap on the feature-block width.  A (1, bf) trigger block is sublane-padded to
# a full sublane tile in VMEM (32 bytes per lane column regardless of dtype),
# so bounding bf keeps the resident trigger buffers <= ~2 MiB each.
_BF_CAP = (2 << 20) // 32  # 65536 lanes


def _sublane_multiple(dtype) -> int:
    """Minimum sublane tile: 8 for 32-bit, 16 for 16-bit, 32 for 8-bit dtypes."""
    bits = jnp.dtype(dtype).itemsize * 8
    return max(8, 256 // bits)


def _choose_blocks(n: int, f: int, dtype) -> tuple[int, int]:
    """Pick (bn, bf) so each block is ~_TARGET_BLOCK_BYTES and lane-dense."""
    itemsize = jnp.dtype(dtype).itemsize
    sub = _sublane_multiple(dtype)
    target_elems = max(sub * _LANE, _TARGET_BLOCK_BYTES // itemsize)

    # ---- feature (lane) block ----
    if f % _LANE == 0 and f > _BF_CAP:
        units = f // _LANE
        cap_units = max(1, _BF_CAP // _LANE)
        d = min(units, cap_units)
        while units % d:  # largest divisor of `units` that is <= cap_units
            d -= 1
        if d * 2 < cap_units:
            # No decent divisor: take a fat non-divisor block and accept a
            # single ragged (masked) trailing feature block instead of
            # shrinking every block.
            d = cap_units
        bf = d * _LANE
    else:
        # Whole feature axis in one block (block dim == full dim is always
        # legal, even when f % 128 != 0 -> no wrapper-side padding needed).
        # TODO(synk): a huge, non-128-aligned f would want an in-kernel masked
        # edge block instead of one full-width block.
        bf = f

    # ---- batch (sublane) block ----
    bn_cap = max(sub, (target_elems // bf) // sub * sub)
    if n <= bn_cap:
        bn = n  # full batch dim is always a legal block dim
    else:
        bn = bn_cap
        # Prefer a bn that divides n (no ragged trailing batch block), but only
        # if it stays within 2x of the cap (avoid degenerate tiny blocks).
        lo = max(sub, (bn_cap // 2 // sub) * sub)
        for cand in range(bn_cap, lo - 1, -sub):
            if n % cand == 0:
                bn = cand
                break
    return bn, bf


def _blend_kernel(img_ref, trig_ref, out_ref, *, alpha: float):
    # img_ref : (bn, bf) rows of flattened images
    # trig_ref: (1,  bf) flattened trigger, broadcast over the bn rows
    # out_ref : (bn, bf)
    out_dtype = out_ref.dtype
    img = img_ref[...].astype(jnp.float32)
    trig = trig_ref[...].astype(jnp.float32)
    # (1 - alpha) * img + alpha * trig, written with one fewer multiply.
    blended = img + jnp.float32(alpha) * (trig - img)
    if jnp.issubdtype(out_dtype, jnp.integer):
        # Integer (uint8 PIL-style) images: round and clamp like PIL.Image.blend.
        info = jnp.iinfo(out_dtype)
        blended = jnp.clip(jnp.rint(blended), info.min, info.max)
    out_ref[...] = blended.astype(out_dtype)


def whole_blended_trigger(img: jax.Array, trigger: jax.Array, alpha: float) -> jax.Array:
    """out = (1 - alpha) * img + alpha * trigger  (trigger broadcast over batch)."""
    n, c, h, w = img.shape
    assert trigger.shape == (c, h, w), (trigger.shape, img.shape)
    f = c * h * w

    # Flatten to a lane-dense 2D problem: rows = batch, cols = C*H*W.
    # (Reshapes of contiguous arrays are metadata-only -- no extra HBM pass.)
    img2 = img.reshape(n, f)
    trig2 = trigger.reshape(1, f)
    if trig2.dtype != img2.dtype:
        trig2 = trig2.astype(img2.dtype)

    bn, bf = _choose_blocks(n, f, img.dtype)
    n_bb = pl.cdiv(n, bn)
    n_fb = pl.cdiv(f, bf)

    kernel = functools.partial(_blend_kernel, alpha=float(alpha))

    if n_fb == 1:
        # Common case: the whole flattened image width is one feature block.
        # Flat 1-D parallel grid over batch blocks (always shardable across
        # both v7x TensorCores); the trigger block index is constant, so it is
        # DMA'd into VMEM exactly once and reused by every grid step.
        grid = (n_bb,)
        img_spec = pl.BlockSpec((bn, bf), lambda ib: (ib, 0))
        trig_spec = pl.BlockSpec((1, bf), lambda ib: (0, 0))
        out_spec = pl.BlockSpec((bn, bf), lambda ib: (ib, 0))
        dims = ("parallel",)
    else:
        # Large images: feature blocks on the outer axis (trigger block only
        # changes n_fb times in total), batch blocks inner.  Both parallel.
        grid = (n_fb, n_bb)
        img_spec = pl.BlockSpec((bn, bf), lambda jf, ib: (ib, jf))
        trig_spec = pl.BlockSpec((1, bf), lambda jf, ib: (0, jf))
        out_spec = pl.BlockSpec((bn, bf), lambda jf, ib: (ib, jf))
        dims = ("parallel", "parallel")

    out2 = pl.pallas_call(
        kernel,
        out_shape=jax.ShapeDtypeStruct((n, f), img.dtype),
        grid_spec=pltpu.PrefetchScalarGridSpec(
            num_scalar_prefetch=0,
            grid=grid,
            in_specs=[img_spec, trig_spec],
            out_specs=out_spec,
        ),
        compiler_params=pltpu.CompilerParams(
            dimension_semantics=dims,
            # ~4 MiB img + ~4 MiB out blocks, double-buffered, plus the
            # sublane-padded trigger buffers: < ~24 MiB.  Set explicitly so the
            # fat blocks also fit v5e's 16 MiB default scoped VMEM.
            vmem_limit_bytes=32 << 20,
        ),
        cost_estimate=pl.CostEstimate(
            flops=3 * n * f,
            transcendentals=0,
            bytes_accessed=(2 * n * f + f) * img.dtype.itemsize,
        ),
    )(img2, trig2)

    return out2.reshape(n, c, h, w)


if __name__ == "__main__":
    # Small, module-consistent shapes: RGB image, input_size=16, batch=2.
    batch, channels, input_size = 2, 3, 16
    alpha = 0.2

    key = jax.random.PRNGKey(0)
    k_img, k_trig = jax.random.split(key)

    # "Images" in [0, 1] float32 (a tensorized stand-in for PIL RGB images).
    img = jax.random.uniform(
        k_img, (batch, channels, input_size, input_size), dtype=jnp.float32
    )
    # Deterministically-initialized trigger image (synthetic; no file load).
    # TODO(synk): PIL.Image.open/resize of the trigger file has no Pallas
    # equivalent; the trigger tensor is synthesized in-script.
    trigger = jax.random.uniform(
        k_trig, (channels, input_size, input_size), dtype=jnp.float32
    )

    out = whole_blended_trigger(img, trigger, alpha)
    out = jax.block_until_ready(out)

    # Sanity check against a pure-JAX reference of the blend.
    ref = (1.0 - alpha) * img + alpha * trigger[None]
    assert out.shape == img.shape
    assert jnp.allclose(out, ref, atol=1e-5), "mismatch vs reference blend"

    print("KERNEL_OK")
</pallas_src>

<mosaic_0001>
module attributes {stable_mosaic.version = 11 : i64} {
  func.func @_blend_kernel(%arg0: i32, %arg1: memref<2x768xf32, #tpu.memory_space<vmem>>, %arg2: memref<1x768xf32, #tpu.memory_space<vmem>>, %arg3: memref<2x768xf32, #tpu.memory_space<vmem>>) attributes {dimension_semantics = [#tpu.dimension_semantics<parallel>], iteration_bounds = array<i64: 1>, scalar_prefetch = 0 : i64, scratch_operands = 0 : i64, tpu.core_type = #tpu.core_type<tc>, window_params = [{transform_indices = @transform_0, window_bounds = array<i64: 2, 768>}, {pipeline_mode = #tpu.pipeline_mode<synchronous>, transform_indices = @transform_1, window_bounds = array<i64: 1, 768>}, {transform_indices = @transform_2, window_bounds = array<i64: 2, 768>}]} {
    %c0 = arith.constant 0 : index
    %c0_0 = arith.constant 0 : index
    %0 = vector.load %arg1[%c0, %c0_0] : memref<2x768xf32, #tpu.memory_space<vmem>>, vector<2x768xf32>
    %c0_1 = arith.constant 0 : index
    %c0_2 = arith.constant 0 : index
    %1 = vector.load %arg2[%c0_1, %c0_2] : memref<1x768xf32, #tpu.memory_space<vmem>>, vector<1x768xf32>
    %2 = vector.broadcast %1 : vector<1x768xf32> to vector<2x768xf32>
    %3 = arith.subf %2, %0 : vector<2x768xf32>
    %cst = arith.constant 2.000000e-01 : f32
    %4 = vector.broadcast %cst : f32 to vector<2x768xf32>
    %5 = arith.mulf %4, %3 : vector<2x768xf32>
    %6 = arith.addf %0, %5 : vector<2x768xf32>
    %c0_3 = arith.constant 0 : index
    %c0_4 = arith.constant 0 : index
    %7 = vector.load %arg3[%c0_3, %c0_4] : memref<2x768xf32, #tpu.memory_space<vmem>>, vector<2x768xf32>
    tpu.vector_store %arg3[%c0_3, %c0_4], %6 {strides = array<i32>} : memref<2x768xf32, #tpu.memory_space<vmem>>, vector<2x768xf32>,
    return
  }
  func.func @transform_0(%arg0: i32) -> (i32, i32) {
    %c0_i32 = arith.constant 0 : i32
    %c0_i32_0 = arith.constant 0 : i32
    return %arg0, %c0_i32 : i32, i32
  }
  func.func @transform_1(%arg0: i32) -> (i32, i32) {
    %c0_i32 = arith.constant 0 : i32
    %c0_i32_0 = arith.constant 0 : i32
    %c0_i32_1 = arith.constant 0 : i32
    return %c0_i32, %c0_i32_0 : i32, i32
  }
  func.func @transform_2(%arg0: i32) -> (i32, i32) {
    %c0_i32 = arith.constant 0 : i32
    %c0_i32_0 = arith.constant 0 : i32
    return %arg0, %c0_i32 : i32, i32
  }
}

</mosaic_0001>

<bundles_post_ra>
// kernel: tpu_custom_call.1
= control target key start
LH: loop header
LB: loop body
LE: loop exit
PB: predicated region body
PF: predicated region fallthrough
CT: control target
= control target key end

     0   :  { %7 = vsyncpa [#allocation3], 0  ;;  %s300_s0 = inlined_call_operand.hbm [shape: f32[2,768], index: 0, kind: input, shape index: {}]   ;;  %s301_s1 = inlined_call_operand.hbm [shape: f32[1,768], index: 1, kind: input, shape index: {}]   ;;  %s302_s2 = inlined_call_operand.hbm [shape: f32[2,768], index: 2, kind: output, shape index: {}]  }
   0x1   :  { %8 = vsyncpa [#allocation6], 0 }
   0x2   :  { %9 = vsyncpa [#allocation4], 0  ;;  %s245_s9 = smov [#allocation2]   ;;  %s246_s11 = smov [#allocation5]  }
   0x3   :  { %s16_s10 = sshll.u32 %s245_s9, 4  ;;  %s26_s12 = sshll.u32 %s246_s11, 4  ;;  %s17_s10 = int_to_ptr.vmem [resolvable:$true] %s16_s10  ;;  %s27_s12 = int_to_ptr.vmem [resolvable:$true] %s26_s12 }
   0x4   :  { %s173_s15 = scalar_lea.hbm %s300_s0, 192 }
   0x5   :  { %p174_p0 = scmp.ne.s32.totalorder %s300_s0, %s173_s15  ;;  %p177_p1 = scmp.lt.u32.totalorder %s173_s15, %s300_s0 }
   0x7   :  { %p179_p2 = pnand %p177_p1, %p174_p0 }
   0x9   :  { %182 = shalt.err (!%p179_p2)
}
   0xa   :  { %s183_s20 = scalar_lea.vmem %s17_s10, 192  ;;  %p188_p4 = scmp.lt.s32.totalorder %s17_s10, %s17_s10 }
   0xb   :  { %p184_p3 = scmp.ne.s32.totalorder %s17_s10, %s183_s20  ;;  %p189_p5 = scmp.lt.s32.totalorder %s183_s20, %s183_s20 }
   0xd   :  { %p190_p6 = por %p189_p5, %p188_p4 }
   0xf   :  { %p191_p7 = pnand %p190_p6, %p184_p3 }
  0x11   :  { %194 = shalt.err (!%p191_p7)
}
  0x12   :  { %19 = dma.hbm_to_vmem [thread:$0]  %s300_s0, 192, %s17_s10, [#allocation3]  }
  0x13   :  { %s195_s25 = scalar_lea.hbm %s301_s1, 96 }
  0x14   :  { %p196_p8 = scmp.ne.s32.totalorder %s301_s1, %s195_s25  ;;  %p199_p9 = scmp.lt.u32.totalorder %s195_s25, %s301_s1 }
  0x16   :  { %p201_p10 = pnand %p199_p9, %p196_p8 }
  0x18   :  { %204 = shalt.err (!%p201_p10)
}
  0x19   :  { %s205_s30 = scalar_lea.vmem %s27_s12, 96  ;;  %p210_p12 = scmp.lt.s32.totalorder %s27_s12, %s27_s12 }
  0x1a   :  { %p206_p11 = scmp.ne.s32.totalorder %s27_s12, %s205_s30  ;;  %p211_p13 = scmp.lt.s32.totalorder %s205_s30, %s205_s30 }
  0x1c   :  { %p212_p0 = por %p211_p13, %p210_p12 }
  0x1e   :  { %p213_p1 = pnand %p212_p0, %p206_p11 }
  0x20   :  { %216 = shalt.err (!%p213_p1)
}
  0x21   :  { %29 = dma.hbm_to_vmem [thread:$0]  %s301_s1, 96, %s27_s12, [#allocation6]  }
  0x22   :  { %239 = dma.done.wait [#allocation3], 192  }
  0x23   :  { %240 = vsyncadd [#allocation3], 4294967104 }
  0x24   :  { %241 = dma.done.wait [#allocation6], 96  }
  0x25   :  { %242 = vsyncadd [#allocation6], 4294967200  ;;  %v40_v0 = vlaneseq  ;;  %v247_v1 = vmov 1983009808   ;;  %v36_v11 = vld [vmem:[#allocation2] sm:$0xff]  ;;  %s248_s1 = smov [#allocation7]  }
  0x26   :  { %v74_v2 = vunpack.c.l.s4 %v247_v1  ;;  %v38_v12 = vld [vmem:[#allocation5] sm:$0x3f]  ;;  %v37_v14 = vld [vmem:[#allocation2 + $0x8] sm:$0xf]  ;;  %v72_v18 = vcombine.high %v36_v11, %v36_v11  ;;  %s158_s4 = sshll.u32 %s248_s1, 4  ;;  %s159_s4 = int_to_ptr.vmem [resolvable:$true] %s158_s4 }
  0x27   :  { %v41_v3 = vshrl.u32 %v40_v0, 7  ;;  %s217_s5 = scalar_lea.vmem %s159_s4, 192  ;;  %p222_p3 = scmp.lt.s32.totalorder %s159_s4, %s159_s4 }
  0x28   :  { %v75_v4 = vunpack.c.0.s8 %v74_v2  ;;  %p218_p2 = scmp.ne.s32.totalorder %s159_s4, %s217_s5  ;;  %p223_p4 = scmp.lt.s32.totalorder %s217_s5, %s217_s5 }
  0x29   :  { %v42_v5 = vsub.s32 0, %v41_v3  ;;  %v46_v6 = vsub.s32 1, %v41_v3  ;;  %v50_v7 = vsub.s32 2, %v41_v3  ;;  %v58_v9 = vsub.s32 4, %v41_v3 }
  0x2a   :  { %v78_v8 = vsub.s32 %v75_v4, %v41_v3  ;;  %v62_v10 = vsub.s32 5, %v41_v3  ;;  %v54_v13 = vsub.s32 3, %v41_v3  ;;  %p224_p5 = por %p223_p4, %p222_p3 }
  0x2b   :  { %v43_v15 = vrot.slane %v38_v12, %v42_v5  ;;  %v47_v16 = vrot.slane %v38_v12, %v46_v6  ;;  %v51_v17 = vrot.slane %v38_v12, %v50_v7  ;;  %v59_v20 = vrot.slane %v38_v12, %v58_v9 }
  0x2c   :  { %v79_v19 = vrot.slane %v36_v11, %v78_v8  ;;  %v63_v21 = vrot.slane %v38_v12, %v62_v10  ;;  %v95_v22 = vrot.slane %v37_v14, %v78_v8  ;;  %v55_v23 = vrot.slane %v38_v12, %v54_v13  ;;  %p225_p6 = pnand %p224_p5, %p218_p2 }
  0x2d   :  { %v86_v24 = vrot.slane %v72_v18, %v78_v8 }
  0x2e   :  { %v87_v25 = vcombine.high %v79_v19, %v79_v19  ;;  %v103_v26 = vsub.f32 %v43_v15, %v79_v19  ;;  %v96_v27 = vcombine.high %v95_v22, %v95_v22  ;;  %v107_v28 = vsub.f32 %v59_v20, %v95_v22 }
  0x2f   :  { %v88_v29 = vcombine.high %v86_v24, %v86_v24  ;;  %v105_v31 = vsub.f32 %v51_v17, %v86_v24 }
  0x30   :  { %v104_v30 = vsub.f32 %v47_v16, %v87_v25  ;;  %v109_v32 = vmul.f32 0.2, %v103_v26  ;;  %v108_v33 = vsub.f32 %v63_v21, %v96_v27  ;;  %v113_v34 = vmul.f32 0.2, %v107_v28 }
  0x31   :  { %v106_v35 = vsub.f32 %v55_v23, %v88_v29  ;;  %v111_v37 = vmul.f32 0.2, %v105_v31 }
  0x32   :  { %v110_v36 = vmul.f32 0.2, %v104_v30  ;;  %v114_v38 = vmul.f32 0.2, %v108_v33 }
  0x33   :  { %v112_v39 = vmul.f32 0.2, %v106_v35 }
  0x34   :  { %v121_v40 = vcombine.low %v109_v32, %v110_v36  ;;  %v138_v41 = vcombine.low %v113_v34, %v114_v38 }
  0x35   :  { %v122_v42 = vcombine.low %v111_v37, %v112_v39 }
  0x36   :  { %v129_v43 = vrot.slane %v121_v40, %v78_v8  ;;  %v145_v44 = vrot.slane %v138_v41, %v78_v8 }
  0x37   :  { %v136_v45 = vrot.slane %v122_v42, %v78_v8 }
  0x38   :  { %v149_v46 = vadd.f32 %v145_v44, %v37_v14 }
  0x39   :  { %v137_v47 = vcombine.low %v129_v43, %v136_v45 }
  0x3a   :  { %151 = vst [vmem:[#allocation7 + $0x8] sm:$0xf] %v149_v46 }
  0x3b   :  { %v148_v48 = vadd.f32 %v137_v47, %v36_v11 }
  0x3d   :  { %150 = vst [vmem:[#allocation7] sm:$0xff] %v148_v48 }
  0x3e   :  { %228 = shalt.err (!%p225_p6)
}
  0x3f   :  { %s229_s8 = scalar_lea.hbm %s302_s2, 192 }
  0x40   :  { %p230_p7 = scmp.ne.s32.totalorder %s302_s2, %s229_s8  ;;  %p233_p8 = scmp.lt.u32.totalorder %s229_s8, %s302_s2 }
  0x42   :  { %p235_p9 = pnand %p233_p8, %p230_p7 }
  0x44   :  { %238 = shalt.err (!%p235_p9)
}
  0x45   :  { %161 = dma.vmem_to_hbm [thread:$0]  %s159_s4, 192, %s302_s2, [#allocation4]  }
  0x46   :  { %243 = dma.done.wait [#allocation4], 192  }
  0x47   :  { %244 = vsyncadd [#allocation4], 4294967104 }
  0x48   :  { %165 = vsyncpa [#allocation3], 1 }
  0x49   :  { %166 = vsyncpa [#allocation6], 1 }
  0x4a   :  { %167 = vsyncpa [#allocation4], 1 }

</bundles_post_ra>
